<compile_context>
chip_gen: v5e
topology: v5e:2x2
jax: 0.10.0
libtpu: 0.0.40
codegen_flags: <defaults>
</compile_context>

<pallas_src>
import functools

import jax
import jax.numpy as jnp
import numpy as np
from jax.experimental import pallas as pl
from jax.experimental.pallas import tpu as pltpu


def _basic_block_kernel(x_ref, w_ref, p_ref, o_ref, *, n_valid, eps):
    """Fused circular Conv1d (as one im2col matmul) + bias + ReLU + BatchNorm1d.

    x_ref : (K*Cin, Npad)  bf16 im2col slab, lane-dense, zero-padded cols >= n_valid
    w_ref : (bc, K*Cin)    bf16 flattened conv weights for this Cout block
    p_ref : (bc, 3)        f32 packed per-channel params [bias, gamma, beta]
    o_ref : (bc, Npad)     f32 output slab (lane-dense, unmasked stores)
    """
    # Single lane-dense MXU dot, f32 accumulation.
    y = jnp.dot(w_ref[...], x_ref[...], preferred_element_type=jnp.float32)

    bias = p_ref[:, 0:1]
    gamma = p_ref[:, 1:2]
    beta = p_ref[:, 2:3]

    # Conv bias + ReLU (f32 VPU).
    y = jnp.maximum(y + bias, 0.0)                               # (bc, Npad)

    # BatchNorm1d training-mode stats over the valid columns only.
    col = jax.lax.broadcasted_iota(jnp.int32, (1, y.shape[1]), 1)
    valid = col < n_valid
    ym = jnp.where(valid, y, 0.0)                                # NaN-safe masking
    inv_n = 1.0 / n_valid
    s1 = jnp.sum(ym, axis=1, keepdims=True)                      # (bc, 1)
    s2 = jnp.sum(ym * ym, axis=1, keepdims=True)                 # (bc, 1)
    mean = s1 * inv_n
    var = jnp.maximum(s2 * inv_n - mean * mean, 0.0)             # biased variance, f32
    scale = jax.lax.rsqrt(var + eps) * gamma                     # (bc, 1)
    shift = beta - mean * scale                                  # (bc, 1)

    # FMA-shaped epilogue: one mul + one add over the full slab.
    o_ref[...] = (y * scale + shift).astype(o_ref.dtype)


def basic_block_forward(x, w, b, gamma, beta, *, n_adj=4, dilation=1, eps=1e-5):
    """x: (B, Cin, L) NCW. w: (Cout, Cin, K) PyTorch Conv1d layout."""
    B, Cin, L = x.shape
    Cout, _, K = w.shape
    assert K == 2 * n_adj + 1

    p = n_adj * dilation
    N = B * L                                    # all columns valid (no garbage cols)
    Npad = int(-(-N // 128) * 128)               # round up to 128 lanes -> unmasked vst
    KC = K * Cin

    # ---- wrapper-side layout plumbing (XLA) ----
    # Circular pad (matches torch.cat([x[...,-p:], x, x[...,:p]], dim=2)).
    xpad = jnp.concatenate([x[..., -p:], x, x[..., :p]], axis=-1)        # (B, Cin, Lpad)
    # im2col: row (k*Cin + c), column (b*L + l)  ==  xpad[b, c, l + k*dilation].
    taps = jnp.stack(
        [xpad[:, :, k * dilation:k * dilation + L] for k in range(K)],
        axis=1)                                                          # (B, K, Cin, L)
    x_im = jnp.transpose(taps, (1, 2, 0, 3)).reshape(KC, N)              # (K*Cin, B*L)
    x_im = jnp.pad(x_im, ((0, 0), (0, Npad - N))).astype(jnp.bfloat16)

    # Flattened weights matching the im2col row ordering (tap-major, then Cin).
    w_flat = jnp.transpose(w, (0, 2, 1)).reshape(Cout, KC).astype(jnp.bfloat16)

    # Packed per-channel params: one small input instead of three.
    params = jnp.stack([b, gamma, beta], axis=1).astype(jnp.float32)     # (Cout, 3)

    # Cout grid axis (per-channel BN stats -> blocks independent). Split only when the
    # halves stay (8,·)-aligned; on v7x this shards across the two TensorCores.
    block_cout = Cout // 2 if (Cout % 16 == 0) else Cout
    grid = (Cout // block_cout,)

    kernel = functools.partial(_basic_block_kernel, n_valid=N, eps=eps)

    out_flat = pl.pallas_call(
        kernel,
        out_shape=jax.ShapeDtypeStruct((Cout, Npad), jnp.float32),
        grid_spec=pltpu.PrefetchScalarGridSpec(
            num_scalar_prefetch=0,
            grid=grid,
            in_specs=[
                pl.BlockSpec((KC, Npad), lambda i: (0, 0)),          # im2col slab
                pl.BlockSpec((block_cout, KC), lambda i: (i, 0)),    # weights
                pl.BlockSpec((block_cout, 3), lambda i: (i, 0)),     # packed params
            ],
            out_specs=pl.BlockSpec((block_cout, Npad), lambda i: (i, 0)),
        ),
        compiler_params=pltpu.CompilerParams(
            dimension_semantics=("parallel",)),
    )(x_im, w_flat, params)

    # Gather-free recovery of (B, Cout, L): static slice + reshape + transpose.
    out = out_flat[:, :N].reshape(Cout, B, L)
    return jnp.transpose(out, (1, 0, 2))


def _reference_forward(x, w, b, gamma, beta, *, n_adj, dilation, eps=1e-5):
    """Pure-JAX (f32) reference replicating the PyTorch BasicBlock forward."""
    p = n_adj * dilation
    xp = jnp.concatenate([x[..., -p:], x, x[..., :p]], axis=-1)
    y = jax.lax.conv_general_dilated(
        xp, w, window_strides=(1,), padding='VALID',
        rhs_dilation=(dilation,), dimension_numbers=('NCH', 'OIH', 'NCH'))
    y = y + b[None, :, None]
    y = jnp.maximum(y, 0.0)
    mean = jnp.mean(y, axis=(0, 2), keepdims=True)
    var = jnp.mean((y - mean) ** 2, axis=(0, 2), keepdims=True)
    y = (y - mean) / jnp.sqrt(var + eps)
    return y * gamma[None, :, None] + beta[None, :, None]


if __name__ == "__main__":
    # BasicBlock(state_dim=4, out_state_dim=8, conv_type='grid', n_adj=4)
    B, Cin, Cout, L = 2, 4, 8, 16
    n_adj, dilation = 4, 1
    K = 2 * n_adj + 1

    key = jax.random.PRNGKey(0)
    kx, kw, kb = jax.random.split(key, 3)

    x = jax.random.normal(kx, (B, Cin, L), dtype=jnp.float32)
    # PyTorch shapes: conv weight (Cout, Cin, K), conv bias (Cout,).
    w = 0.1 * jax.random.normal(kw, (Cout, Cin, K), dtype=jnp.float32)
    b = 0.1 * jax.random.normal(kb, (Cout,), dtype=jnp.float32)
    # BatchNorm1d default affine init: weight=1, bias=0.
    gamma = jnp.ones((Cout,), jnp.float32)
    beta = jnp.zeros((Cout,), jnp.float32)

    out = basic_block_forward(x, w, b, gamma, beta,
                              n_adj=n_adj, dilation=dilation)
    out = jax.block_until_ready(out)

    ref = _reference_forward(x, w, b, gamma, beta,
                             n_adj=n_adj, dilation=dilation)
    # bf16 matmul operands (f32 accumulation) -> slightly looser tolerance than pure f32.
    np.testing.assert_allclose(np.asarray(out), np.asarray(ref),
                               rtol=2e-2, atol=2e-2)
    assert out.shape == (B, Cout, L)
    print("KERNEL_OK")
</pallas_src>

<mosaic_0001>
module attributes {stable_mosaic.version = 11 : i64} {
  func.func @_basic_block_kernel(%arg0: i32, %arg1: memref<36x128xbf16, #tpu.memory_space<vmem>>, %arg2: memref<8x36xbf16, #tpu.memory_space<vmem>>, %arg3: memref<8x3xf32, #tpu.memory_space<vmem>>, %arg4: memref<8x128xf32, #tpu.memory_space<vmem>>) attributes {dimension_semantics = [#tpu.dimension_semantics<parallel>], iteration_bounds = array<i64: 1>, scalar_prefetch = 0 : i64, scratch_operands = 0 : i64, tpu.core_type = #tpu.core_type<tc>, window_params = [{pipeline_mode = #tpu.pipeline_mode<synchronous>, transform_indices = @transform_0, window_bounds = array<i64: 36, 128>}, {transform_indices = @transform_1, window_bounds = array<i64: 8, 36>}, {transform_indices = @transform_2, window_bounds = array<i64: 8, 3>}, {transform_indices = @transform_3, window_bounds = array<i64: 8, 128>}]} {
    %c0 = arith.constant 0 : index
    %c0_0 = arith.constant 0 : index
    %0 = vector.load %arg2[%c0, %c0_0] : memref<8x36xbf16, #tpu.memory_space<vmem>>, vector<8x36xbf16>
    %c0_1 = arith.constant 0 : index
    %c0_2 = arith.constant 0 : index
    %1 = vector.load %arg1[%c0_1, %c0_2] : memref<36x128xbf16, #tpu.memory_space<vmem>>, vector<36x128xbf16>
    %cst = arith.constant dense<0.000000e+00> : vector<8x128xf32>
    %2 = tpu.matmul %0, %1, %cst {dimension_numbers = #tpu.dot_dimension_numbers<[1], [0], [0], [1], [0, 0, 1, 1], [], []>} : vector<8x36xbf16>, vector<36x128xbf16>, vector<8x128xf32> -> vector<8x128xf32>
    %c0_3 = arith.constant 0 : index
    %c0_4 = arith.constant 0 : index
    %3 = vector.load %arg3[%c0_3, %c0_4] : memref<8x3xf32, #tpu.memory_space<vmem>>, vector<8x1xf32>
    %c0_5 = arith.constant 0 : index
    %c1 = arith.constant 1 : index
    %4 = vector.load %arg3[%c0_5, %c1] : memref<8x3xf32, #tpu.memory_space<vmem>>, vector<8x1xf32>
    %c0_6 = arith.constant 0 : index
    %c2 = arith.constant 2 : index
    %5 = vector.load %arg3[%c0_6, %c2] : memref<8x3xf32, #tpu.memory_space<vmem>>, vector<8x1xf32>
    %6 = vector.broadcast %3 : vector<8x1xf32> to vector<8x128xf32>
    %7 = arith.addf %2, %6 : vector<8x128xf32>
    %cst_7 = arith.constant 0.000000e+00 : f32
    %8 = vector.broadcast %cst_7 : f32 to vector<8x128xf32>
    %9 = arith.maximumf %7, %8 : vector<8x128xf32>
    %10 = tpu.iota {dimensions = array<i32: 1>} : vector<1x128xi32>
    %c32_i32 = arith.constant 32 : i32
    %11 = vector.broadcast %c32_i32 : i32 to vector<1x128xi32>
    %12 = arith.cmpi slt, %10, %11 : vector<1x128xi32>
    %cst_8 = arith.constant 0.000000e+00 : f32
    %13 = vector.shape_cast %12 : vector<1x128xi1> to vector<1x128xi1>
    %14 = vector.broadcast %13 : vector<1x128xi1> to vector<8x128xi1>
    %15 = vector.broadcast %cst_8 : f32 to vector<8x128xf32>
    %16 = arith.select %14, %9, %15 : vector<8x128xi1>, vector<8x128xf32>
    %cst_9 = arith.constant dense<0.000000e+00> : vector<8xf32>
    %17 = vector.multi_reduction <add>, %16, %cst_9 [1] : vector<8x128xf32> to vector<8xf32>
    %18 = vector.shape_cast %17 : vector<8xf32> to vector<8x1xf32>
    %19 = arith.mulf %16, %16 : vector<8x128xf32>
    %cst_10 = arith.constant dense<0.000000e+00> : vector<8xf32>
    %20 = vector.multi_reduction <add>, %19, %cst_10 [1] : vector<8x128xf32> to vector<8xf32>
    %21 = vector.shape_cast %20 : vector<8xf32> to vector<8x1xf32>
    %cst_11 = arith.constant 3.125000e-02 : f32
    %22 = vector.broadcast %cst_11 : f32 to vector<8x1xf32>
    %23 = arith.mulf %18, %22 : vector<8x1xf32>
    %cst_12 = arith.constant 3.125000e-02 : f32
    %24 = vector.broadcast %cst_12 : f32 to vector<8x1xf32>
    %25 = arith.mulf %21, %24 : vector<8x1xf32>
    %26 = arith.mulf %23, %23 : vector<8x1xf32>
    %27 = arith.subf %25, %26 : vector<8x1xf32>
    %cst_13 = arith.constant 0.000000e+00 : f32
    %28 = vector.broadcast %cst_13 : f32 to vector<8x1xf32>
    %29 = arith.maximumf %27, %28 : vector<8x1xf32>
    %cst_14 = arith.constant 9.99999974E-6 : f32
    %30 = vector.broadcast %cst_14 : f32 to vector<8x1xf32>
    %31 = arith.addf %29, %30 : vector<8x1xf32>
    %32 = math.rsqrt %31 : vector<8x1xf32>
    %33 = arith.mulf %32, %4 : vector<8x1xf32>
    %34 = arith.mulf %23, %33 : vector<8x1xf32>
    %35 = arith.subf %5, %34 : vector<8x1xf32>
    %36 = vector.broadcast %33 : vector<8x1xf32> to vector<8x128xf32>
    %37 = arith.mulf %9, %36 : vector<8x128xf32>
    %38 = vector.broadcast %35 : vector<8x1xf32> to vector<8x128xf32>
    %39 = arith.addf %37, %38 : vector<8x128xf32>
    %c0_15 = arith.constant 0 : index
    %c0_16 = arith.constant 0 : index
    %40 = vector.load %arg4[%c0_15, %c0_16] : memref<8x128xf32, #tpu.memory_space<vmem>>, vector<8x128xf32>
    tpu.vector_store %arg4[%c0_15, %c0_16], %39 {strides = array<i32>} : memref<8x128xf32, #tpu.memory_space<vmem>>, vector<8x128xf32>,
    return
  }
  func.func @transform_0(%arg0: i32) -> (i32, i32) {
    %c0_i32 = arith.constant 0 : i32
    %c0_i32_0 = arith.constant 0 : i32
    %c0_i32_1 = arith.constant 0 : i32
    return %c0_i32, %c0_i32_0 : i32, i32
  }
  func.func @transform_1(%arg0: i32) -> (i32, i32) {
    %c0_i32 = arith.constant 0 : i32
    %c0_i32_0 = arith.constant 0 : i32
    return %arg0, %c0_i32 : i32, i32
  }
  func.func @transform_2(%arg0: i32) -> (i32, i32) {
    %c0_i32 = arith.constant 0 : i32
    %c0_i32_0 = arith.constant 0 : i32
    return %arg0, %c0_i32 : i32, i32
  }
  func.func @transform_3(%arg0: i32) -> (i32, i32) {
    %c0_i32 = arith.constant 0 : i32
    %c0_i32_0 = arith.constant 0 : i32
    return %arg0, %c0_i32 : i32, i32
  }
}

</mosaic_0001>

<bundles_post_ra>
// kernel: tpu_custom_call.1
= control target key start
LH: loop header
LB: loop body
LE: loop exit
PB: predicated region body
PF: predicated region fallthrough
CT: control target
= control target key end

     0   :  { %8 = vsyncpa [#allocation3], 0  ;;  %s262_s0 = inlined_call_operand.hbm [shape: bf16[36,128], index: 0, kind: input, shape index: {}]   ;;  %s263_s1 = inlined_call_operand.vmem [shape: bf16[8,36], index: 1, kind: input, shape index: {}]   ;;  %s264_s2 = inlined_call_operand.vmem [shape: f32[8,3], index: 2, kind: input, shape index: {}]   ;;  %s265_s3 = inlined_call_operand.hbm [shape: f32[8,128], index: 3, kind: output, shape index: {}]  }
   0x1   :  { %9 = vsyncpa [#allocation4], 0  ;;  %s14_s14 = sshll.u32 %s262_s0, 4  ;;  %s222_s15 = smov [#allocation2]   ;;  %s15_s14 = int_to_ptr.hbm [resolvable:$true] %s14_s14 }
   0x2   :  { %s16_s16 = sshll.u32 %s222_s15, 4  ;;  %s223_s17 = smov 64   ;;  %s17_s16 = int_to_ptr.vmem [resolvable:$true] %s16_s16 }
   0x3   :  { %s224_s18 = smov 4  }
   0x4   :  { %22 = dma.hbm_to_vmem [thread:$0]  %s15_s14, 320, %s17_s16, [#allocation3], %s223_s17, %s223_s17, %s224_s18  }
   0x5   :  { %218 = dma.done.wait [#allocation3], 320  }
   0x6   :  { %219 = vsyncadd [#allocation3], 4294966976  ;;  %v225_v0 = vmov 0   ;;  %v37_v1 = vld [vmem:[#allocation2 + $0x10] sm:$0x3]  ;;  %v38_v3 = vld [vmem:[%s264_s2] sm:$0xff]  ;;  %v81_v9 = vlaneseq }
   0x7   :  { %164 = vset.pattern.permute.xlu0 %v225_v0  ;;  %v53_v2 = vunpack.c.l.b16 %v37_v1  ;;  %vm63_vm0 = vcmask 1041408   ;;  %v155_v6 = vld [vmem:[#allocation2 + $0x8] sm:$0xff]  ;;  %v154_v7 = vld [vmem:[#allocation2] sm:$0xff]  ;;  %vm59_vm1 = vcmask 293888   ;;  %v226_v18 = vmov 1   ;;  %s229_s2 = smov [#allocation5]  }
   0x8   :  { %41 = vperm.xlu0 %164, %v38_v3   ;;  %v32_v8 = vld [vmem:[%s263_s1] sm:$0xf]  ;;  %v82_v11 = vand.u32 127, %v81_v9  ;;  %165 = vset.pattern.permute.xlu2 %v226_v18  ;;  %s227_s1 = smov 1   ;;  %v228_v36 = vmov 2   ;;  %s133_s22 = sshll.u32 %s229_s2, 4  ;;  %s134_s22 = int_to_ptr.vmem [resolvable:$true] %s133_s22 }
   0x9   :  { %v56_v4 = vpack.c.b16 %v53_v2, %v53_v2  ;;  %s135_s25 = sshll.u32 %s265_s3, 4  ;;  %s136_s25 = int_to_ptr.hbm [resolvable:$true] %s135_s25 }
   0xa   :  { %vm83_vm2 = vcmp.lt.s32.totalorder %v82_v11, 32 }
   0xb   :  { %v65_v5 = vsel %vm63_vm0, %v56_v4, 0 }
   0xc   :  { %72 = vmatpush.bf16.msra.mxu0 %v65_v5 }
  0x10   :  { %73 = vmatpush.bf16.msra.mxu0 %v155_v6  ;;  %167 = vset.pattern.permute.xlu0 %v228_v36 }
  0x14   :  { %74 = vmatpush.bf16.msra.mxu0 %v154_v7 }
  0x17   :  { %153 = vmatmul.msk.bf16.vlgmr.msra.gmra.mxu0 %vm59_vm1, %v32_v8 }
  0x7a   :  { %v42_v10 = vpop.permute.xlu0 %41 }
  0x94   :  { %v76_v12 = vpop.f32.mrf.mxu0 }
  0x95   :  { %v77_v13 = vadd.f32 %v76_v12, %v42_v10 }
  0x97   :  { %v80_v14 = vmax.f32 %v77_v13, 0.0 }
  0x99   :  { %v86_v15 = vsel %vm83_vm2, %v80_v14, 0.0 }
  0x9a   :  { %87 = vadd.xlane.f32.xlu0 %v86_v15  ;;  %v89_v16 = vmul.f32 %v86_v15, %v86_v15 }
  0x9c   :  { %v78_v17 = vpop.f32.mrf.mxu0  ;;  %90 = vadd.xlane.f32.xlu1 %v89_v16 }
 0x10d   :  { %v88_v19 = vpop.xlane.xlu0 %87 }
 0x10e   :  { %v92_v20 = vmul.f32 0.03125, %v88_v19 }
 0x10f   :  { %v91_v21 = vpop.xlane.xlu1 %90 }
 0x110   :  { %v94_v22 = vmul.f32 %v92_v20, %v92_v20  ;;  %v93_v23 = vmul.f32 0.03125, %v91_v21 }
 0x112   :  { %v95_v24 = vsub.f32 %v93_v23, %v94_v22 }
 0x114   :  { %v96_v25 = vmax.f32 %v95_v24, 0.0 }
 0x116   :  { %v97_v26 = vadd.f32 1e-05, %v96_v25 }
 0x118   :  { %168 = vrsqrt.f32 %v97_v26  ;;  %vm104_vm4 = vweird.f32 %v97_v26 }
 0x11e   :  { %v169_v27 = vpop.eup %168 }
 0x11f   :  { %v99_v28 = vmul.f32 %v169_v27, %v97_v26  ;;  %vm105_vm3 = vweird.f32 %v169_v27 }
 0x120   :  { %vm106_vm5 = vmor %vm104_vm4, %vm105_vm3 }
 0x121   :  { %v100_v29 = vmul.f32 %v169_v27, %v99_v28 }
 0x123   :  { %v101_v30 = vmul.f32 0.5, %v100_v29 }
 0x125   :  { %v102_v31 = vsub.f32 1.5, %v101_v30 }
 0x127   :  { %v103_v32 = vmul.f32 %v169_v27, %v102_v31 }
 0x129   :  { %v107_v33 = vsel %vm106_vm5, %v169_v27, %v103_v32 }
 0x12a   :  { %v108_v34 = vmul.f32 %v107_v33, %v38_v3 }
 0x12c   :  { %117 = vperm.xlu2 %165, %v108_v34   ;;  %v109_v35 = vmul.f32 %v108_v34, %v92_v20 }
 0x12e   :  { %111 = vrot.lane.b32.xlu1 %v109_v35, %s227_s1 }
 0x134   :  { %166 = vset.pattern.permute.xlu2 %v228_v36 }
 0x186   :  { %v118_v39 = vpop.permute.xlu2 %117 }
 0x187   :  { %v120_v40 = vmul.f32 %v118_v39, %v80_v14 }
 0x1a0   :  { %v112_v37 = vpop.permute.xlu1 %111 }
 0x1a1   :  { %v114_v38 = vsub.f32 %v38_v3, %v112_v37 }
 0x1a3   :  { %123 = vperm.xlu2 %166, %v114_v38  }
 0x1fd   :  { %v124_v41 = vpop.permute.xlu2 %123 }
 0x1fe   :  { %v126_v42 = vadd.f32 %v124_v41, %v120_v40 }
 0x200   :  { %127 = vst [vmem:[#allocation5] sm:$0xff] %v126_v42 }
 0x201   :  { %138 = dma.vmem_to_hbm [thread:$0]  %s134_s22, 128, %s136_s25, [#allocation4]  }
 0x202   :  { %220 = dma.done.wait [#allocation4], 128  }
 0x203   :  { %221 = vsyncadd [#allocation4], 4294967168 }
 0x204   :  { %143 = vsyncpa [#allocation3], 1 }
 0x205   :  { %144 = vsyncpa [#allocation4], 1 }

</bundles_post_ra>
